<compile_context>
chip_gen: v6e
topology: v6e:2x2x1
jax: 0.10.0
libtpu: 0.0.40
codegen_flags: <defaults>
</compile_context>

<pallas_src>
import functools
from enum import Enum

import numpy as np
import jax
import jax.numpy as jnp
from jax import lax
from jax.experimental import pallas as pl
from jax.experimental.pallas import tpu as pltpu


class Difficulty(Enum):
    Easy = 1
    SemiHard = 2
    Hard = 3


# ---------------------------------------------------------------------------
# helpers
# ---------------------------------------------------------------------------
def _round_up(x, m):
    return ((x + m - 1) // m) * m


def _vmem_capacity_bytes():
    try:
        return int(pltpu.get_tpu_info().vmem_capacity_bytes)
    except Exception:
        return 64 * 1024 * 1024          # conservative (v7x per-core) fallback


def _vmem_limit(est_bytes, cap_bytes):
    # ~80% of physical VMEM; never below 32 MiB, never below 1.5x the estimate.
    return int(min(int(0.8 * cap_bytes),
                   max(int(1.5 * est_bytes), 32 * 1024 * 1024)))


def _pick_tile(total, target, align=8):
    """Largest multiple of `align` that divides `total` and is <= target."""
    if total <= align:
        return total
    target = int(max(align, min(target, total)))
    target -= target % align
    t = target
    while t >= align:
        if total % t == 0:
            return t
        t -= align
    return total


# ---------------------------------------------------------------------------
# shared in-kernel pairwise-distance block (MXU Gram + precomputed f32 norms)
# ---------------------------------------------------------------------------
def _pdist_block(e_tile, e_full, sq_col, sq_row, *, cosine):
    """(tm, n) pairwise distances between e_tile rows and e_full rows.

    e_tile/e_full arrive already in the MXU dtype (f32 or bf16); squared norms
    are precomputed f32 inputs (no ones-row matmul, no eye-masked diagonal).
    """
    dot = lax.dot_general(e_tile, e_full, (((1,), (1,)), ((), ())),
                          preferred_element_type=jnp.float32)          # (tm, n)
    if cosine:
        den = jnp.sqrt(sq_col) * jnp.sqrt(sq_row)                      # (tm, n)
        inv = jnp.where(den > 0.0, 1.0 / den, 0.0)                     # safe for zero rows
        return 1.0 - dot * inv
    d = sq_row - 2.0 * dot + sq_col
    d = jnp.maximum(d, 0.0)                                            # d[d < 0] = 0
    # (1-mask)*sqrt(d + mask*1e-16)  ==  where(d == 0, 0, sqrt(d))
    return jnp.where(d == 0.0, 0.0, jnp.sqrt(d))


# ---------------------------------------------------------------------------
# Difficulty.Hard  (batch_hard_triplet_loss) -- anchor-row tiled, parallel grid
# ---------------------------------------------------------------------------
def _hard_kernel(lab_col_ref, lab_row_ref, e_tile_ref, e_full_ref,
                 sqc_ref, sqr_ref, out_ref, *, margin, cosine, b):
    tm = lab_col_ref.shape[0]
    pd = _pdist_block(e_tile_ref[...], e_full_ref[...],
                      sqc_ref[...], sqr_ref[...], cosine=cosine)       # (tm, b)
    eq = lab_col_ref[...] == lab_row_ref[...]                          # (tm, b)

    m0 = pl.program_id(0) * tm
    row_ids = m0 + lax.broadcasted_iota(jnp.int32, pd.shape, 0)
    col_ids = lax.broadcasted_iota(jnp.int32, pd.shape, 1)
    mask_ap = jnp.logical_and(eq, row_ids != col_ids)
    mask_an = jnp.logical_not(eq)

    hardest_pos = jnp.max(jnp.where(mask_ap, pd, 0.0), axis=1, keepdims=True)
    rowmax = jnp.max(pd, axis=1, keepdims=True)
    # select-based form of pdist + rowmax*(1 - mask_an)
    hardest_neg = jnp.min(jnp.where(mask_an, pd, pd + rowmax),
                          axis=1, keepdims=True)

    tl = jnp.maximum(hardest_pos - hardest_neg + margin, 0.0)          # (tm, 1)
    row_valid = (m0 + lax.broadcasted_iota(jnp.int32, (tm, 1), 0)) < b
    part = jnp.sum(jnp.where(row_valid, tl, 0.0))
    out_ref[...] = jnp.broadcast_to(part, (1, 1, 128))                 # lane-dense partial


# ---------------------------------------------------------------------------
# Difficulty.SemiHard -- mining mask is independent of the positive index, so
# the whole branch is anchor-row reductions; row tiled, parallel grid.
# ---------------------------------------------------------------------------
def _semihard_kernel(lab_col_ref, lab_row_ref, e_tile_ref, e_full_ref,
                     sqc_ref, sqr_ref, loss_ref, npos_ref, *, margin, cosine):
    tm = lab_col_ref.shape[0]
    pd = _pdist_block(e_tile_ref[...], e_full_ref[...],
                      sqc_ref[...], sqr_ref[...], cosine=cosine)       # (tm, b)
    eq = lab_col_ref[...] == lab_row_ref[...]
    adjn = jnp.logical_not(eq)

    m0 = pl.program_id(0) * tm
    row_ids = m0 + lax.broadcasted_iota(jnp.int32, pd.shape, 0)
    col_ids = lax.broadcasted_iota(jnp.int32, pd.shape, 1)
    # padded anchors carry label -1 (never equal to a real label) -> auto-excluded
    mask_pos = jnp.logical_and(eq, row_ids != col_ids)

    rowmax = jnp.max(pd, axis=1, keepdims=True)
    rowmin = jnp.min(pd, axis=1, keepdims=True)
    has_neg = jnp.max(adjn.astype(jnp.float32), axis=1, keepdims=True) > 0.0
    neg_out = jnp.min(jnp.where(adjn, pd, rowmax), axis=1, keepdims=True)
    neg_in = jnp.max(jnp.where(adjn, pd, rowmin), axis=1, keepdims=True)
    shn = jnp.where(has_neg, neg_out, neg_in)                          # (tm, 1)

    loss_mat = margin + pd - shn
    part_loss = jnp.sum(jnp.where(mask_pos, jnp.maximum(loss_mat, 0.0), 0.0))
    part_np = jnp.sum(mask_pos.astype(jnp.float32))
    loss_ref[...] = jnp.broadcast_to(part_loss, (1, 1, 128))
    npos_ref[...] = jnp.broadcast_to(part_np, (1, 1, 128))


# ---------------------------------------------------------------------------
# Difficulty.Easy -- call 1: pairwise distances (row tiled, MXU)
# ---------------------------------------------------------------------------
def _pdist_kernel(e_tile_ref, e_full_ref, sqc_ref, sqr_ref, out_ref, *, cosine):
    out_ref[...] = _pdist_block(e_tile_ref[...], e_full_ref[...],
                                sqc_ref[...], sqr_ref[...], cosine=cosine)


# ---------------------------------------------------------------------------
# Difficulty.Easy -- call 2: mining on a 2-D (anchor-row, positive-col) grid.
# pdist arrives twice via BlockSpecs: a (tm, Bp) row block and a (tm, ty) thr
# block -- no scratch, no recompute, no dynamic lane slicing.
# ---------------------------------------------------------------------------
def _easy_kernel(lab_col_ref, lab_row_ref, lab_y_ref, pdr_ref, thr_ref,
                 loss_ref, npos_ref, *, margin, b):
    tm, bp = pdr_ref.shape
    ty = thr_ref.shape[1]
    x0 = pl.program_id(0) * tm
    y0 = pl.program_id(1) * ty

    lab_c = lab_col_ref[...]                                   # (tm, 1)
    lab_r = lab_row_ref[...]                                   # (1, bp)
    lab_y = lab_y_ref[...]                                     # (1, ty)
    pdr = pdr_ref[...]                                         # (tm, bp)
    thr = thr_ref[...]                                         # (tm, ty)

    col_ids = lax.broadcasted_iota(jnp.int32, (tm, bp), 1)
    col_valid = col_ids < b
    adjn = jnp.logical_and(lab_c != lab_r, col_valid)          # valid negatives only
    dneg = jnp.where(adjn, pdr, jnp.inf)                       # mask folded into values

    rowmin = jnp.min(jnp.where(col_valid, pdr, jnp.inf), axis=1, keepdims=True)
    neg_in = jnp.max(jnp.where(adjn, pdr, rowmin), axis=1, keepdims=True)   # (tm, 1)

    # (anchor x, positive y, candidate negative j) slab: min over negatives j
    # with d(x,j) > d(x,y); non-candidates are already +inf and never win.
    d3 = dneg[:, None, :]                                      # (tm, 1, bp)
    mmin = jnp.min(jnp.where(d3 > thr[:, :, None], d3, jnp.inf), axis=-1)   # (tm, ty)
    shn = jnp.where(mmin < jnp.inf, mmin, neg_in)              # (tm, ty)

    x_ids = x0 + lax.broadcasted_iota(jnp.int32, (tm, ty), 0)
    y_ids = y0 + lax.broadcasted_iota(jnp.int32, (tm, ty), 1)
    mask_pos = jnp.logical_and(
        jnp.logical_and(lab_c == lab_y, x_ids != y_ids),
        jnp.logical_and(x_ids < b, y_ids < b))

    loss_mat = margin + thr - shn
    part_loss = jnp.sum(jnp.where(mask_pos, jnp.maximum(loss_mat, 0.0), 0.0))
    part_np = jnp.sum(mask_pos.astype(jnp.float32))
    loss_ref[...] = jnp.broadcast_to(part_loss, (1, 1, 1, 128))
    npos_ref[...] = jnp.broadcast_to(part_np, (1, 1, 1, 128))


# ---------------------------------------------------------------------------
# Wrapper
# ---------------------------------------------------------------------------
def triplet_loss_pallas(labels, embeddings, margin=0.2, cosine=False,
                        difficulty=Difficulty.Easy, use_bf16_mxu=None,
                        row_tile=None, y_tile=None):
    b, d = embeddings.shape
    dpad = max(128, _round_up(d, 128))
    if use_bf16_mxu is None:
        # bf16 Gram is safe for cosine; keep f32 for euclidean (cancellation risk).
        use_bf16_mxu = bool(cosine)
    mxu_dtype = jnp.bfloat16 if use_bf16_mxu else jnp.float32
    esz = 2 if use_bf16_mxu else 4

    emb32 = embeddings.astype(jnp.float32)
    if dpad > d:
        emb32 = jnp.pad(emb32, ((0, 0), (0, dpad - d)))
    sq = jnp.sum(emb32 * emb32, axis=1)                 # f32 squared norms (once)
    emb_mxu = emb32.astype(mxu_dtype)
    lab = labels.astype(jnp.int32)

    vmem_cap = _vmem_capacity_bytes()
    margin = float(margin)

    # ------------------- Hard / SemiHard: anchor-row tiled ------------------
    if difficulty in (Difficulty.Hard, Difficulty.SemiHard):
        bm = _round_up(b, 8)
        budget = int(0.25 * vmem_cap)
        tm_cap = max(8, (budget // max(1, 12 * b * 4)) // 8 * 8)
        tm_target = int(row_tile) if row_tile is not None else 256
        tm = _pick_tile(bm, min(tm_target, tm_cap, 256))
        num_m = bm // tm

        emb_rows = jnp.pad(emb_mxu, ((0, bm - b), (0, 0)))
        lab_col = jnp.pad(lab, (0, bm - b), constant_values=-1).reshape(bm, 1)
        lab_row = lab.reshape(1, b)
        sq_col = jnp.pad(sq, (0, bm - b)).reshape(bm, 1)
        sq_row = sq.reshape(1, b)

        est = (2 * tm * dpad * esz + 2 * b * dpad * esz
               + 12 * tm * b * 4 + 4 * b * 4 + (2 << 20))
        cp = pltpu.CompilerParams(dimension_semantics=("parallel",),
                                  vmem_limit_bytes=_vmem_limit(est, vmem_cap))
        in_specs = [
            pl.BlockSpec((tm, 1), lambda m: (m, 0)),
            pl.BlockSpec((1, b), lambda m: (0, 0)),
            pl.BlockSpec((tm, dpad), lambda m: (m, 0)),
            pl.BlockSpec((b, dpad), lambda m: (0, 0)),
            pl.BlockSpec((tm, 1), lambda m: (m, 0)),
            pl.BlockSpec((1, b), lambda m: (0, 0)),
        ]

        if difficulty == Difficulty.Hard:
            parts = pl.pallas_call(
                functools.partial(_hard_kernel, margin=margin, cosine=cosine, b=b),
                grid=(num_m,),
                in_specs=in_specs,
                out_specs=pl.BlockSpec((1, 1, 128), lambda m: (m, 0, 0)),
                out_shape=jax.ShapeDtypeStruct((num_m, 1, 128), jnp.float32),
                compiler_params=cp,
            )(lab_col, lab_row, emb_rows, emb_mxu, sq_col, sq_row)
            return jnp.sum(parts[:, 0, 0]) / b

        loss_p, np_p = pl.pallas_call(
            functools.partial(_semihard_kernel, margin=margin, cosine=cosine),
            grid=(num_m,),
            in_specs=in_specs,
            out_specs=[pl.BlockSpec((1, 1, 128), lambda m: (m, 0, 0))] * 2,
            out_shape=(jax.ShapeDtypeStruct((num_m, 1, 128), jnp.float32),
                       jax.ShapeDtypeStruct((num_m, 1, 128), jnp.float32)),
            compiler_params=cp,
        )(lab_col, lab_row, emb_rows, emb_mxu, sq_col, sq_row)
        return jnp.sum(loss_p[:, 0, 0]) / (jnp.sum(np_p[:, 0, 0]) + 1e-8)

    # ------------------------- Difficulty.Easy ------------------------------
    bp = _round_up(b, 8) if b <= 128 else _round_up(b, 128)
    emb_bp = jnp.pad(emb_mxu, ((0, bp - b), (0, 0)))
    lab_bp = jnp.pad(lab, (0, bp - b), constant_values=-1)
    lab_col = lab_bp.reshape(bp, 1)
    lab_row = lab_bp.reshape(1, bp)
    sq_bp = jnp.pad(sq, (0, bp - b))
    sq_col = sq_bp.reshape(bp, 1)
    sq_row = sq_bp.reshape(1, bp)

    # call 1: pdist (bp, bp), computed exactly once (row-tiled Gram on the MXU)
    tmp_ = _pick_tile(bp, 256)
    num_mp = bp // tmp_
    est1 = (2 * tmp_ * dpad * esz + 2 * bp * dpad * esz
            + 6 * tmp_ * bp * 4 + 4 * bp * 4 + (2 << 20))
    pdist = pl.pallas_call(
        functools.partial(_pdist_kernel, cosine=cosine),
        grid=(num_mp,),
        in_specs=[pl.BlockSpec((tmp_, dpad), lambda m: (m, 0)),
                  pl.BlockSpec((bp, dpad), lambda m: (0, 0)),
                  pl.BlockSpec((tmp_, 1), lambda m: (m, 0)),
                  pl.BlockSpec((1, bp), lambda m: (0, 0))],
        out_specs=pl.BlockSpec((tmp_, bp), lambda m: (m, 0)),
        out_shape=jax.ShapeDtypeStruct((bp, bp), jnp.float32),
        compiler_params=pltpu.CompilerParams(
            dimension_semantics=("parallel",),
            vmem_limit_bytes=_vmem_limit(est1, vmem_cap)),
    )(emb_bp, emb_bp, sq_col, sq_row)

    # call 2: mining on a 2-D (anchor, positive) grid; lane tile is 128-aligned
    ty = _pick_tile(bp, int(y_tile) if y_tile is not None else 128, align=128)
    slab_budget = int(0.25 * vmem_cap)
    tm_cap = max(8, (slab_budget // max(1, 3 * ty * bp * 4)) // 8 * 8)
    tm_target = int(row_tile) if row_tile is not None else 128
    tm = _pick_tile(bp, min(tm_target, tm_cap, 256))
    num_x = bp // tm
    num_y = bp // ty

    est2 = (2 * tm * bp * 4 + 2 * tm * ty * 4 + 3 * tm * ty * bp * 4
            + 10 * tm * bp * 4 + 4 * bp * 4 + (2 << 20))
    loss_p, np_p = pl.pallas_call(
        functools.partial(_easy_kernel, margin=margin, b=b),
        grid=(num_x, num_y),
        in_specs=[pl.BlockSpec((tm, 1), lambda x, y: (x, 0)),
                  pl.BlockSpec((1, bp), lambda x, y: (0, 0)),
                  pl.BlockSpec((1, ty), lambda x, y: (0, y)),
                  pl.BlockSpec((tm, bp), lambda x, y: (x, 0)),
                  pl.BlockSpec((tm, ty), lambda x, y: (x, y))],
        out_specs=[pl.BlockSpec((1, 1, 1, 128), lambda x, y: (x, y, 0, 0))] * 2,
        out_shape=(jax.ShapeDtypeStruct((num_x, num_y, 1, 128), jnp.float32),
                   jax.ShapeDtypeStruct((num_x, num_y, 1, 128), jnp.float32)),
        compiler_params=pltpu.CompilerParams(
            dimension_semantics=("parallel", "parallel"),
            vmem_limit_bytes=_vmem_limit(est2, vmem_cap)),
    )(lab_col, lab_row, lab_row, pdist, pdist)

    return jnp.sum(loss_p[:, :, 0, 0]) / (jnp.sum(np_p[:, :, 0, 0]) + 1e-8)


# ---------------------------------------------------------------------------
# Pure-JAX reference mirroring the PyTorch module (correctness check only)
# ---------------------------------------------------------------------------
def _ref_pairwise(e, squared=False, cosine=False):
    dot = e @ e.T
    if cosine:
        norm = jnp.sqrt(jnp.sum(e * e, axis=1, keepdims=True))
        return 1.0 - dot / (norm @ norm.T)
    sq = jnp.diag(dot)
    d = sq[None, :] - 2.0 * dot + sq[:, None]
    d = jnp.maximum(d, 0.0)
    if not squared:
        m = (d == 0.0).astype(jnp.float32)
        d = (1.0 - m) * jnp.sqrt(d + m * 1e-16)
    return d


def _ref_triplet(labels, e, margin, easy=True, cosine=False):
    B = labels.shape[0]
    eq = labels[None, :] == labels[:, None]
    adjn = ~eq
    pd = _ref_pairwise(e, cosine=cosine)
    pd_tile = jnp.tile(pd, (B, 1))
    mask = jnp.tile(adjn, (B, 1))
    if easy:
        mask = mask & (pd_tile > pd.T.reshape(-1, 1))
    mask_final = (jnp.sum(mask.astype(jnp.float32), axis=1, keepdims=True)
                  > 0.0).reshape(B, B).T
    adjn_f = adjn.astype(jnp.float32)
    mask_f = mask.astype(jnp.float32)
    axis_max = jnp.max(pd_tile, axis=1, keepdims=True)
    neg_out = (jnp.min((pd_tile - axis_max) * mask_f, axis=1, keepdims=True)
               + axis_max).reshape(B, B).T
    axis_min = jnp.min(pd, axis=1, keepdims=True)
    neg_in = jnp.tile(jnp.max((pd - axis_min) * adjn_f, axis=1, keepdims=True)
                      + axis_min, (1, B))
    shn = jnp.where(mask_final, neg_out, neg_in)
    loss_mat = margin + pd - shn
    eye = jnp.eye(B, dtype=bool)
    mask_pos = (eq & ~eye).astype(jnp.float32)
    num_pos = jnp.sum(mask_pos)
    return jnp.sum(jnp.maximum(loss_mat * mask_pos, 0.0)) / (num_pos + 1e-8)


def _ref_hard(labels, e, margin, cosine=False):
    eq = labels[None, :] == labels[:, None]
    eye = jnp.eye(labels.shape[0], dtype=bool)
    pd = _ref_pairwise(e, cosine=cosine)
    mask_ap = (eq & ~eye).astype(jnp.float32)
    mask_an = (~eq).astype(jnp.float32)
    hp = jnp.max(mask_ap * pd, axis=1, keepdims=True)
    max_an = jnp.max(pd, axis=1, keepdims=True)
    hn = jnp.min(pd + max_an * (1.0 - mask_an), axis=1, keepdims=True)
    return jnp.mean(jnp.maximum(hp - hn + margin, 0.0))


if __name__ == "__main__":
    key = jax.random.PRNGKey(0)
    margin = 0.2

    def make_case(b, d, n_cls, salt):
        k = jax.random.fold_in(key, salt)
        lab = jnp.array([i % n_cls for i in range(b)], dtype=jnp.int32)
        emb = jax.random.normal(k, (b, d), dtype=jnp.float32)
        return lab, emb

    def check(got, ref, rtol, atol):
        np.testing.assert_allclose(np.asarray(jax.block_until_ready(got)),
                                   np.asarray(ref), rtol=rtol, atol=atol)

    # --- case 1: B=24, D=32, no padding, single-tile grids (euclidean, f32) --
    lab1, emb1 = make_case(24, 32, 4, 1)
    check(triplet_loss_pallas(lab1, emb1, margin, difficulty=Difficulty.Easy),
          _ref_triplet(lab1, emb1, margin, easy=True), 2e-2, 2e-2)
    check(triplet_loss_pallas(lab1, emb1, margin, difficulty=Difficulty.SemiHard),
          _ref_triplet(lab1, emb1, margin, easy=False), 1e-3, 1e-3)
    check(triplet_loss_pallas(lab1, emb1, margin, difficulty=Difficulty.Hard),
          _ref_hard(lab1, emb1, margin), 1e-3, 1e-3)

    # --- case 2: B=200, D=48, forced multi-tile grids + row/col padding ------
    lab2, emb2 = make_case(200, 48, 7, 2)
    check(triplet_loss_pallas(lab2, emb2, margin, difficulty=Difficulty.Easy,
                              row_tile=64, y_tile=128),
          _ref_triplet(lab2, emb2, margin, easy=True), 2e-2, 2e-2)
    check(triplet_loss_pallas(lab2, emb2, margin, difficulty=Difficulty.SemiHard,
                              row_tile=64),
          _ref_triplet(lab2, emb2, margin, easy=False), 1e-3, 1e-3)
    check(triplet_loss_pallas(lab2, emb2, margin, difficulty=Difficulty.Hard,
                              row_tile=64),
          _ref_hard(lab2, emb2, margin), 1e-3, 1e-3)

    # --- case 3: B=21 (padded anchor rows) + cosine Easy with bf16 Gram ------
    lab3, emb3 = make_case(21, 40, 5, 3)
    check(triplet_loss_pallas(lab3, emb3, margin, difficulty=Difficulty.Hard),
          _ref_hard(lab3, emb3, margin), 1e-3, 1e-3)
    check(triplet_loss_pallas(lab3, emb3, margin, difficulty=Difficulty.SemiHard),
          _ref_triplet(lab3, emb3, margin, easy=False), 1e-3, 1e-3)
    check(triplet_loss_pallas(lab3, emb3, margin, cosine=True,
                              difficulty=Difficulty.Easy),      # bf16 Gram default
          _ref_triplet(lab3, emb3, margin, easy=True, cosine=True), 2e-2, 2e-2)

    print("KERNEL_OK")
</pallas_src>

<mosaic_0001>
module attributes {stable_mosaic.version = 11 : i64} {
  func.func @_pdist_kernel(%arg0: i32, %arg1: memref<24x128xf32, #tpu.memory_space<vmem>>, %arg2: memref<24x128xf32, #tpu.memory_space<vmem>>, %arg3: memref<24x1xf32, #tpu.memory_space<vmem>>, %arg4: memref<1x24xf32, #tpu.memory_space<vmem>>, %arg5: memref<24x24xf32, #tpu.memory_space<vmem>>) attributes {dimension_semantics = [#tpu.dimension_semantics<parallel>], iteration_bounds = array<i64: 1>, scalar_prefetch = 0 : i64, scratch_operands = 0 : i64, tpu.core_type = #tpu.core_type<tc>, window_params = [{transform_indices = @transform_0, window_bounds = array<i64: 24, 128>}, {pipeline_mode = #tpu.pipeline_mode<synchronous>, transform_indices = @transform_1, window_bounds = array<i64: 24, 128>}, {transform_indices = @transform_2, window_bounds = array<i64: 24, 1>}, {pipeline_mode = #tpu.pipeline_mode<synchronous>, transform_indices = @transform_3, window_bounds = array<i64: 1, 24>}, {transform_indices = @transform_4, window_bounds = array<i64: 24, 24>}]} {
    %c0 = arith.constant 0 : index
    %c0_0 = arith.constant 0 : index
    %0 = vector.load %arg1[%c0, %c0_0] : memref<24x128xf32, #tpu.memory_space<vmem>>, vector<24x128xf32>
    %c0_1 = arith.constant 0 : index
    %c0_2 = arith.constant 0 : index
    %1 = vector.load %arg2[%c0_1, %c0_2] : memref<24x128xf32, #tpu.memory_space<vmem>>, vector<24x128xf32>
    %c0_3 = arith.constant 0 : index
    %c0_4 = arith.constant 0 : index
    %2 = vector.load %arg3[%c0_3, %c0_4] : memref<24x1xf32, #tpu.memory_space<vmem>>, vector<24x1xf32>
    %c0_5 = arith.constant 0 : index
    %c0_6 = arith.constant 0 : index
    %3 = vector.load %arg4[%c0_5, %c0_6] : memref<1x24xf32, #tpu.memory_space<vmem>>, vector<1x24xf32>
    %cst = arith.constant dense<0.000000e+00> : vector<24x24xf32>
    %4 = tpu.matmul %0, %1, %cst {dimension_numbers = #tpu.dot_dimension_numbers<[1], [1], [0], [0], [0, 0, 1, 0], [], []>} : vector<24x128xf32>, vector<24x128xf32>, vector<24x24xf32> -> vector<24x24xf32>
    %cst_7 = arith.constant 2.000000e+00 : f32
    %5 = vector.broadcast %cst_7 : f32 to vector<24x24xf32>
    %6 = arith.mulf %5, %4 : vector<24x24xf32>
    %7 = vector.broadcast %3 : vector<1x24xf32> to vector<24x24xf32>
    %8 = arith.subf %7, %6 : vector<24x24xf32>
    %9 = vector.broadcast %2 : vector<24x1xf32> to vector<24x24xf32>
    %10 = arith.addf %8, %9 : vector<24x24xf32>
    %cst_8 = arith.constant 0.000000e+00 : f32
    %11 = vector.broadcast %cst_8 : f32 to vector<24x24xf32>
    %12 = arith.maximumf %10, %11 : vector<24x24xf32>
    %cst_9 = arith.constant 0.000000e+00 : f32
    %13 = vector.broadcast %cst_9 : f32 to vector<24x24xf32>
    %14 = arith.cmpf oeq, %12, %13 : vector<24x24xf32>
    %15 = math.sqrt %12 : vector<24x24xf32>
    %cst_10 = arith.constant 0.000000e+00 : f32
    %16 = vector.broadcast %cst_10 : f32 to vector<24x24xf32>
    %17 = arith.select %14, %16, %15 : vector<24x24xi1>, vector<24x24xf32>
    %c0_11 = arith.constant 0 : index
    %c0_12 = arith.constant 0 : index
    %18 = vector.load %arg5[%c0_11, %c0_12] : memref<24x24xf32, #tpu.memory_space<vmem>>, vector<24x24xf32>
    tpu.vector_store %arg5[%c0_11, %c0_12], %17 {strides = array<i32>} : memref<24x24xf32, #tpu.memory_space<vmem>>, vector<24x24xf32>,
    return
  }
  func.func @transform_0(%arg0: i32) -> (i32, i32) {
    %c0_i32 = arith.constant 0 : i32
    %c0_i32_0 = arith.constant 0 : i32
    return %arg0, %c0_i32 : i32, i32
  }
  func.func @transform_1(%arg0: i32) -> (i32, i32) {
    %c0_i32 = arith.constant 0 : i32
    %c0_i32_0 = arith.constant 0 : i32
    %c0_i32_1 = arith.constant 0 : i32
    return %c0_i32, %c0_i32_0 : i32, i32
  }
  func.func @transform_2(%arg0: i32) -> (i32, i32) {
    %c0_i32 = arith.constant 0 : i32
    %c0_i32_0 = arith.constant 0 : i32
    return %arg0, %c0_i32 : i32, i32
  }
  func.func @transform_3(%arg0: i32) -> (i32, i32) {
    %c0_i32 = arith.constant 0 : i32
    %c0_i32_0 = arith.constant 0 : i32
    %c0_i32_1 = arith.constant 0 : i32
    return %c0_i32, %c0_i32_0 : i32, i32
  }
  func.func @transform_4(%arg0: i32) -> (i32, i32) {
    %c0_i32 = arith.constant 0 : i32
    %c0_i32_0 = arith.constant 0 : i32
    return %arg0, %c0_i32 : i32, i32
  }
}

</mosaic_0001>

<bundles_post_ra>
// kernel: tpu_custom_call.1
= control target key start
LH: loop header
LB: loop body
LE: loop exit
PB: predicated region body
PF: predicated region fallthrough
CT: control target
= control target key end

     0   :  { %9 = vsyncpa [#allocation3], 0  ;;  %s361_s0 = inlined_call_operand.vmem [shape: f32[24,128], index: 0, kind: input, shape index: {}]   ;;  %s362_s1 = inlined_call_operand.hbm [shape: f32[24,128], index: 1, kind: input, shape index: {}]   ;;  %s363_s2 = inlined_call_operand.vmem [shape: f32[24,1], index: 2, kind: input, shape index: {}]   ;;  %s364_s3 = inlined_call_operand.vmem [shape: f32[1,24], index: 3, kind: input, shape index: {}]   ;;  %s365_s4 = inlined_call_operand.hbm [shape: f32[24,24], index: 4, kind: output, shape index: {}]  }
   0x1   :  { %10 = vsyncpa [#allocation4], 0  ;;  %s290_s15 = smov [#allocation2]  }
   0x2   :  { %s18_s16 = sshll.u32 %s290_s15, 4  ;;  %s19_s16 = int_to_ptr.vmem [resolvable:$true] %s18_s16 }
   0x3   :  { %s254_s17 = scalar_lea.vmem %s19_s16, 384  ;;  %p259_p1 = scmp.lt.s32.totalorder %s19_s16, %s19_s16 }
   0x4   :  { %p255_p0 = scmp.ne.s32.totalorder %s19_s16, %s254_s17  ;;  %p260_p2 = scmp.lt.s32.totalorder %s254_s17, %s254_s17 }
   0x6   :  { %p261_p3 = por %p260_p2, %p259_p1 }
   0x8   :  { %p262_p4 = pnand %p261_p3, %p255_p0 }
   0xa   :  { %265 = shalt.err (!%p262_p4)
}
   0xb   :  { %s291_s18 = smov 128   ;;  %s292_s19 = smov 8  }
   0xc   :  { %24 = dma.hbm_to_vmem [thread:$0]  %s362_s1, 384, %s19_s16, [#allocation3], %s291_s18, %s291_s18, %s292_s19  }
   0xd   :  { %286 = dma.done.wait [#allocation3], 384  }
   0xe   :  { %287 = vsyncadd [#allocation3], 4294966912  ;;  %v293_v0 = vmov 0.0   ;;  %vm294_vm0 = vmmov 0   ;;  %v295_v1 = vmov 0   ;;  %v37_v2 = vld [vmem:[#allocation2 + $0x10] sm:$0xff] }
   0xf   :  { %210 = vmatprep.subr.mxu0 %v293_v0  ;;  %225 = vmatprep.subr.mxu1 %v293_v0  ;;  %v36_v3 = vld [vmem:[#allocation2 + $0x8] sm:$0xff]  ;;  %v38_v4 = vld [vmem:[%s363_s2] sm:$0xff]  ;;  %v40_v5 = vld [vmem:[%s363_s2 + $0x10] sm:$0xff]  ;;  %vm182_vm2 = vcmask 195584  }
  0x10   :  { %216 = vmatprep.mubr.msk.f32.mxu0 %vm294_vm0, %v293_v0  ;;  %219 = vmatprep.mubr.msk.f32.mxu1 %vm294_vm0, %v293_v0  ;;  %v39_v6 = vld [vmem:[%s363_s2 + $0x8] sm:$0xff]  ;;  %v35_v7 = vld [vmem:[#allocation2] sm:$0xff]  ;;  %v34_v10 = vld [vmem:[%s361_s0 + $0x10] sm:$0xff] }
  0x11   :  { %238 = vset.pattern.permute.xlu0 %v295_v1  ;;  %239 = vset.pattern.permute.xlu1 %v295_v1  ;;  %v32_v8 = vld [vmem:[%s361_s0] sm:$0xff]  ;;  %v33_v9 = vld [vmem:[%s361_s0 + $0x8] sm:$0xff]  ;;  %s296_s0 = smov [#allocation5]  }
  0x12   :  { %211 = vmatpush3.xpose.msra.mxu0 %v37_v2  ;;  %228 = vmatpush3.xpose.msra.mxu1 %v37_v2  ;;  %v203_v12 = vld [vmem:[%s364_s3] ss:$0 sm:$0xff]  ;;  %s191_s3 = sshll.u32 %s296_s0, 4  ;;  %s192_s3 = int_to_ptr.vmem [resolvable:$true] %s191_s3 }
  0x13   :  { %212 = vmatprep.subr.mxu0 %v293_v0  ;;  %226 = vmatprep.subr.mxu1 %v293_v0  ;;  %s266_s8 = scalar_lea.vmem %s192_s3, 384  ;;  %p271_p6 = scmp.lt.s32.totalorder %s192_s3, %s192_s3 }
  0x14   :  { %136 = vperm.xlu0 %238, %v38_v4   ;;  %146 = vperm.xlu1 %239, %v40_v5   ;;  %p267_p5 = scmp.ne.s32.totalorder %s192_s3, %s266_s8  ;;  %p272_p7 = scmp.lt.s32.totalorder %s266_s8, %s266_s8 }
  0x16   :  { %213 = vmatpush3.xpose.msra.mxu0 %v36_v3  ;;  %229 = vmatpush3.xpose.msra.mxu1 %v36_v3  ;;  %p273_p8 = por %p272_p7, %p271_p6 }
  0x17   :  { %214 = vmatprep.subr.mxu0 %v293_v0  ;;  %227 = vmatprep.subr.mxu1 %v293_v0 }
  0x18   :  { %141 = vperm.xlu0 %238, %v39_v6   ;;  %p274_p9 = pnand %p273_p8, %p267_p5 }
  0x1a   :  { %215 = vmatpush3.xpose.msra.mxu0 %v35_v7  ;;  %230 = vmatpush3.xpose.msra.mxu1 %v35_v7 }
  0x1d   :  { %217 = vmatmul.mubr.f32.vlgmr.msra.gmra.mxu0 %v32_v8  ;;  %220 = vmatmul.mubr.f32.vlgmr.msra.gmra.mxu1 %v33_v9 }
  0x1e   :  { %222 = vmatprep.mubr.msk.f32.mxu1 %vm294_vm0, %v293_v0 }
  0x21   :  { %223 = vmatmul.mubr.f32.gmra.mxu1 %v34_v10 }
  0x8f   :  { %v137_v11 = vpop.permute.xlu0 %136  ;;  %v147_v27 = vpop.permute.xlu1 %146 }
  0x93   :  { %v142_v17 = vpop.permute.xlu0 %141 }
  0xdd   :  { %v108_v13 = vpop.f32.mrf.mxu0  ;;  %v113_v14 = vpop.f32.mrf.mxu1 }
  0xde   :  { %v122_v15 = vmul.f32 2.0, %v108_v13  ;;  %v123_v16 = vmul.f32 2.0, %v113_v14 }
  0xdf   :  { %v221_v18 = vpop.f32.mrf.mxu1  ;;  %v218_v19 = vpop.f32.mrf.mxu0 }
  0xe0   :  { %v131_v20 = vsub.f32 %v203_v12, %v122_v15  ;;  %v132_v21 = vsub.f32 %v203_v12, %v123_v16 }
  0xe1   :  { %v118_v22 = vpop.f32.mrf.mxu1 }
  0xe2   :  { %v149_v23 = vadd.f32 %v137_v11, %v131_v20  ;;  %v150_v24 = vadd.f32 %v142_v17, %v132_v21  ;;  %v124_v25 = vmul.f32 2.0, %v118_v22 }
  0xe3   :  { %v224_v26 = vpop.f32.mrf.mxu1 }
  0xe4   :  { %v152_v28 = vmax.f32 %v149_v23, 0.0  ;;  %v153_v29 = vmax.f32 %v150_v24, 0.0  ;;  %v133_v30 = vsub.f32 %v203_v12, %v124_v25 }
  0xe6   :  { %240 = vrsqrt.f32 %v152_v28  ;;  %v151_v31 = vadd.f32 %v147_v27, %v133_v30  ;;  %vm160_vm1 = vcmp.eq.f32.partialorder %v152_v28, inf  ;;  %v163_v36 = vand.u32 2147483648, %v152_v28 }
  0xe7   :  { %242 = vrsqrt.f32 %v153_v29  ;;  %vm155_vm3 = vcmp.eq.f32.partialorder %v152_v28, 0.0  ;;  %vm167_vm4 = vcmp.eq.f32.partialorder %v153_v29, inf  ;;  %v170_v39 = vand.u32 2147483648, %v153_v29 }
  0xe8   :  { %v154_v32 = vmax.f32 %v151_v31, 0.0  ;;  %vm156_vm5 = vcmp.eq.f32.partialorder %v153_v29, 0.0 }
  0xea   :  { %244 = vrsqrt.f32 %v154_v32  ;;  %vm174_vm6 = vcmp.eq.f32.partialorder %v154_v32, inf  ;;  %v177_v46 = vand.u32 2147483648, %v154_v32  ;;  %vm157_vm7 = vcmp.eq.f32.partialorder %v154_v32, 0.0 }
  0xf3   :  { %v241_v33 = vpop.eup %240 }
  0xf4   :  { %v243_v34 = vpop.eup %242  ;;  %v159_v35 = vmul.f32 %v241_v33, %v152_v28 }
  0xf5   :  { %v166_v37 = vmul.f32 %v243_v34, %v153_v29 }
  0xf6   :  { %v161_v38 = vsel %vm160_vm1, %v152_v28, %v159_v35 }
  0xf7   :  { %v245_v40 = vpop.eup %244  ;;  %v164_v41 = vsel %vm155_vm3, %v163_v36, %v161_v38  ;;  %v168_v42 = vsel %vm167_vm4, %v153_v29, %v166_v37 }
  0xf8   :  { %v171_v43 = vsel %vm156_vm5, %v170_v39, %v168_v42  ;;  %v173_v44 = vmul.f32 %v245_v40, %v154_v32  ;;  %v179_v45 = vsel %vm155_vm3, 0.0, %v164_v41 }
  0xf9   :  { %v180_v47 = vsel %vm156_vm5, 0.0, %v171_v43  ;;  %183 = vst.msk [vmem:[#allocation5] sm:$0xff] %vm182_vm2, %v179_v45 }
  0xfa   :  { %v175_v48 = vsel %vm174_vm6, %v154_v32, %v173_v44  ;;  %184 = vst.msk [vmem:[#allocation5 + $0x8] sm:$0xff] %vm182_vm2, %v180_v47 }
  0xfb   :  { %v178_v49 = vsel %vm157_vm7, %v177_v46, %v175_v48 }
  0xfc   :  { %v181_v50 = vsel %vm157_vm7, 0.0, %v178_v49 }
  0xfd   :  { %185 = vst.msk [vmem:[#allocation5 + $0x10] sm:$0xff] %vm182_vm2, %v181_v50 }
  0xfe   :  { %277 = shalt.err (!%p274_p9)
}
  0xff   :  { %197 = dma.vmem_to_hbm [thread:$0]  %s192_s3, 384, %s365_s4, [#allocation4], %s291_s18, %s291_s18, %s292_s19  }
 0x100   :  { %288 = dma.done.wait [#allocation4], 384  }
 0x101   :  { %289 = vsyncadd [#allocation4], 4294966912 }
 0x102   :  { %201 = vsyncpa [#allocation3], 1 }
 0x103   :  { %202 = vsyncpa [#allocation4], 1 }

</bundles_post_ra>
